<compile_context>
chip_gen: v7x
topology: tpu7x:2x2x1
jax: 0.10.0
libtpu: 0.0.40
codegen_flags: <defaults>
</compile_context>

<pallas_src>
import functools
import math

import jax
import jax.numpy as jnp
from jax.experimental import pallas as pl
from jax.experimental.pallas import tpu as pltpu


# ----------------------------------------------------------------------------
# Stage A: RGCNConv (relation axis folded into the contraction) + fused
#          Q|K|V|skip projection of TransformerConv.  Tiled over destination rows.
#   adj_ref   : [TILE_N, (R+1)*N] bf16  per-relation mean-normalized adjacency,
#                                       relations stacked along columns; the last
#                                       N columns are the identity (root term)
#   xw_ref    : [(R+1)*N, H1]     bf16  rows r*N+j = x[j]@W_r ; last N rows = x@W_root
#   wqkvs_ref : [H1, 4*D]         bf16  [Wq | Wk | Wv | Wskip]
# ----------------------------------------------------------------------------
def _rgcn_qkvs_kernel(adj_ref, xw_ref, brgcn_ref, wqkvs_ref, bqkvs_ref, qkvs_ref):
    f32 = jnp.float32
    # RGCN: all relations + root in ONE K=(R+1)*N MXU matmul (bf16 in, f32 accum).
    ho = jnp.dot(adj_ref[...], xw_ref[...], preferred_element_type=f32) + brgcn_ref[...]
    # Fused lane-dense Q|K|V|skip projection.
    qkvs_ref[...] = (jnp.dot(ho.astype(jnp.bfloat16), wqkvs_ref[...],
                             preferred_element_type=f32) + bqkvs_ref[...])


# ----------------------------------------------------------------------------
# Stage B: TransformerConv attention (multiplicity-weighted softmax) + skip.
#          Tiled over destination rows; the small QKVS slab stays VMEM-resident.
# ----------------------------------------------------------------------------
def _attention_kernel(qkvs_tile_ref, qkvs_full_ref, mask_ref, y_ref, *, heads, c_per_head):
    f32, bf16 = jnp.float32, jnp.bfloat16
    D = heads * c_per_head
    qt = qkvs_tile_ref[...]          # [T, 4D]  rows of this destination tile (q, skip)
    qf = qkvs_full_ref[...]          # [N, 4D]  all source rows (k, v)
    mask = mask_ref[...]             # [T, N]   multiplicity of edge j -> i
    scale = 1.0 / math.sqrt(c_per_head)

    head_outs = []
    for h in range(heads):           # static unroll (heads is tiny)
        q = qt[:, h * c_per_head:(h + 1) * c_per_head].astype(bf16)
        k = qf[:, D + h * c_per_head:D + (h + 1) * c_per_head].astype(bf16)
        v = qf[:, 2 * D + h * c_per_head:2 * D + (h + 1) * c_per_head].astype(bf16)
        s = jnp.einsum('tc,nc->tn', q, k, preferred_element_type=f32) * scale
        m = jnp.max(s, axis=-1, keepdims=True)
        # No -1e9 sentinel: '* mask' both masks and weights by edge multiplicity
        # (softmax is shift-invariant; masked terms become exactly zero).
        p = jnp.exp(s - m) * mask
        denom = jnp.maximum(jnp.sum(p, axis=-1, keepdims=True), 1e-30)
        alpha = p * pl.reciprocal(denom, approx=True)          # EUP slot, ~free
        head_outs.append(jnp.dot(alpha.astype(bf16), v, preferred_element_type=f32))
    skip = qt[:, 3 * D:4 * D]
    y_ref[...] = jnp.concatenate(head_outs, axis=-1) + skip    # single full-width store


# ----------------------------------------------------------------------------
# Stage C: BatchNorm1d (training-mode batch statistics) + LeakyReLU(0.01) epilogue.
# ----------------------------------------------------------------------------
def _bn_leakyrelu_kernel(y_ref, gamma_ref, beta_ref, out_ref):
    y = y_ref[...]
    mean = jnp.mean(y, axis=0, keepdims=True)
    var = jnp.mean((y - mean) * (y - mean), axis=0, keepdims=True)
    z = (y - mean) * jax.lax.rsqrt(var + 1e-5) * gamma_ref[...] + beta_ref[...]
    out_ref[...] = jnp.where(z >= 0.0, z, 0.01 * z)


# ----------------------------------------------------------------------------
# Glue: graph -> dense normalized adjacency / attention mask; parameters
# ----------------------------------------------------------------------------
def build_rel_adj(edge_index, edge_type, num_nodes, num_relations):
    src, dst = edge_index[0], edge_index[1]
    adj = jnp.zeros((num_relations, num_nodes, num_nodes), jnp.float32)
    adj = adj.at[edge_type, dst, src].add(1.0)       # A[r, i, j] = #edges j->i of relation r
    deg = jnp.sum(adj, axis=-1, keepdims=True)       # per-node, per-relation in-degree
    return adj / jnp.maximum(deg, 1.0)               # mean aggregation


def build_attn_mask(edge_index, num_nodes):
    src, dst = edge_index[0], edge_index[1]
    mask = jnp.zeros((num_nodes, num_nodes), jnp.float32)
    return mask.at[dst, src].add(1.0)                # multiplicity of edge j -> i


def init_params(key, g_dim, h1_dim, h2_dim, heads, num_relations):
    ks = jax.random.split(key, 12)
    d_out = h2_dim * heads

    def w(k, shape, fan_in):
        return jax.random.normal(k, shape, jnp.float32) / math.sqrt(fan_in)

    return dict(
        # RGCNConv
        w_rel=w(ks[0], (num_relations, g_dim, h1_dim), g_dim),
        w_root=w(ks[1], (g_dim, h1_dim), g_dim),
        b_rgcn=jnp.zeros((h1_dim,), jnp.float32),
        # TransformerConv
        wq=w(ks[2], (h1_dim, d_out), h1_dim), bq=0.01 * jax.random.normal(ks[3], (d_out,)),
        wk=w(ks[4], (h1_dim, d_out), h1_dim), bk=0.01 * jax.random.normal(ks[5], (d_out,)),
        wv=w(ks[6], (h1_dim, d_out), h1_dim), bv=0.01 * jax.random.normal(ks[7], (d_out,)),
        ws=w(ks[8], (h1_dim, d_out), h1_dim), bs=0.01 * jax.random.normal(ks[9], (d_out,)),
        # BatchNorm1d
        gamma=jnp.ones((d_out,), jnp.float32),
        beta=jnp.zeros((d_out,), jnp.float32),
    )


def gnn_forward(params, node_features, edge_index, edge_type,
                num_relations, heads, h2_dim, tile_n=None, train_w=False):
    # TODO(synk): train_w=True branch (random_feature_mask / random_edge_pert + PyGCL
    # DualBranchContrast InfoNCE loss) is host-random + external-library code; only the
    # inference path is implemented.
    N, G = node_features.shape
    R = num_relations
    H1 = params["w_root"].shape[1]
    D = heads * h2_dim

    # ---- destination-node tile (multiple of 16 for bf16 sublane packing) + padding ----
    if tile_n is None:
        tile_n = min(128, ((N + 15) // 16) * 16)
    tile_n = max(16, ((tile_n + 15) // 16) * 16)
    n_pad = ((N + tile_n - 1) // tile_n) * tile_n
    x = jnp.zeros((n_pad, G), jnp.float32).at[:N].set(node_features.astype(jnp.float32))

    # ---- XLA-side prep (tiny; the heavy O(R*N^2) arrays stream straight into stage A) ----
    # TODO(synk): for large sparse graphs replace this dense O(R*N^2) materialization with a
    # CSR / edge-list gather driven by PrefetchScalarGridSpec.
    adj = build_rel_adj(edge_index, edge_type, n_pad, R)                    # [R, Np, Np]
    adj_cat = jnp.transpose(adj, (1, 0, 2)).reshape(n_pad, R * n_pad)       # [Np, R*Np]
    adj_all = jnp.concatenate([adj_cat, jnp.eye(n_pad, dtype=jnp.float32)], axis=1)
    adj_all = adj_all.astype(jnp.bfloat16)                                  # [Np, (R+1)*Np]
    mask = build_attn_mask(edge_index, n_pad)                               # [Np, Np] f32

    xw_rel = jnp.einsum('ng,rgh->rnh', x, params["w_rel"]).reshape(R * n_pad, H1)
    xw_all = jnp.concatenate([xw_rel, x @ params["w_root"]], axis=0)        # [(R+1)*Np, H1]
    xw_all = xw_all.astype(jnp.bfloat16)

    w_qkvs = jnp.concatenate([params["wq"], params["wk"], params["wv"], params["ws"]],
                             axis=1).astype(jnp.bfloat16)                   # [H1, 4D]
    b_qkvs = jnp.concatenate([params["bq"], params["bk"], params["bv"],
                              params["bs"]]).reshape(1, 4 * D).astype(jnp.float32)
    b_rgcn = params["b_rgcn"].reshape(1, H1).astype(jnp.float32)

    n_tiles = n_pad // tile_n
    k_all = (R + 1) * n_pad

    # ---- Stage A: RGCN + fused QKVS projection (parallel grid over node tiles) ----
    cost_a = pl.CostEstimate(
        flops=2 * n_pad * k_all * H1 + 2 * n_pad * H1 * 4 * D,
        transcendentals=0,
        bytes_accessed=adj_all.size * 2 + xw_all.size * 2 + n_pad * 4 * D * 4)
    qkvs = pl.pallas_call(
        _rgcn_qkvs_kernel,
        out_shape=jax.ShapeDtypeStruct((n_pad, 4 * D), jnp.float32),
        grid=(n_tiles,),
        in_specs=[
            pl.BlockSpec((tile_n, k_all), lambda i: (i, 0)),
            pl.BlockSpec((k_all, H1), lambda i: (0, 0)),
            pl.BlockSpec((1, H1), lambda i: (0, 0)),
            pl.BlockSpec((H1, 4 * D), lambda i: (0, 0)),
            pl.BlockSpec((1, 4 * D), lambda i: (0, 0)),
        ],
        out_specs=pl.BlockSpec((tile_n, 4 * D), lambda i: (i, 0)),
        compiler_params=pltpu.CompilerParams(
            dimension_semantics=("parallel",),
            vmem_limit_bytes=64 * 1024 * 1024),
        cost_estimate=cost_a,
    )(adj_all, xw_all, b_rgcn, w_qkvs, b_qkvs)

    # ---- Stage B: attention + skip (parallel grid over node tiles) ----
    cost_b = pl.CostEstimate(
        flops=4 * n_pad * n_pad * D,
        transcendentals=heads * n_pad * n_pad,
        bytes_accessed=mask.size * 4 + 2 * qkvs.size * 4 + n_pad * D * 4)
    attn_kern = functools.partial(_attention_kernel, heads=heads, c_per_head=h2_dim)
    y = pl.pallas_call(
        attn_kern,
        out_shape=jax.ShapeDtypeStruct((n_pad, D), jnp.float32),
        grid=(n_tiles,),
        in_specs=[
            pl.BlockSpec((tile_n, 4 * D), lambda i: (i, 0)),   # this tile's rows (q, skip)
            pl.BlockSpec((n_pad, 4 * D), lambda i: (0, 0)),    # all source rows (k, v)
            pl.BlockSpec((tile_n, n_pad), lambda i: (i, 0)),   # mask rows of this tile
        ],
        out_specs=pl.BlockSpec((tile_n, D), lambda i: (i, 0)),
        compiler_params=pltpu.CompilerParams(
            dimension_semantics=("parallel",),
            vmem_limit_bytes=64 * 1024 * 1024),
        cost_estimate=cost_b,
    )(qkvs, qkvs, mask)

    # ---- Stage C: BatchNorm1d + LeakyReLU epilogue (needs global batch stats) ----
    y = y[:N]                                            # drop padded rows before BN stats
    out = pl.pallas_call(
        _bn_leakyrelu_kernel,
        out_shape=jax.ShapeDtypeStruct((N, D), jnp.float32),
    )(y, params["gamma"].reshape(1, D), params["beta"].reshape(1, D))
    return out, 0


if __name__ == "__main__":
    key = jax.random.PRNGKey(0)

    # Small shapes consistent with the module:
    N = 32            # nodes (utterances in the dialogue graph)
    g_dim = 32
    h1_dim = 32
    h2_dim = 16
    heads = 2         # args.gnn_nheads
    n_speakers = 2
    num_relations = 2 * n_speakers ** 2   # = 8
    E = 96            # edges

    k1, k2, k3, k4, k5 = jax.random.split(key, 5)
    node_features = jax.random.normal(k1, (N, g_dim), jnp.float32)
    src = jax.random.randint(k2, (E,), 0, N)
    dst = jax.random.randint(k3, (E,), 0, N)
    edge_index = jnp.stack([src, dst], axis=0)          # [2, E]
    edge_type = jax.random.randint(k4, (E,), 0, num_relations)

    params = init_params(k5, g_dim, h1_dim, h2_dim, heads, num_relations)

    # tile_n=16 -> grid=(2,) so the tiled / pipelined path is actually exercised.
    out, loss = gnn_forward(params, node_features, edge_index, edge_type,
                            num_relations, heads, h2_dim, tile_n=16, train_w=False)
    out = jax.block_until_ready(out)
    assert out.shape == (N, h2_dim * heads)
    assert bool(jnp.all(jnp.isfinite(out)))
    print("KERNEL_OK")
</pallas_src>

<mosaic_0001>
module attributes {stable_mosaic.version = 11 : i64} {
  func.func @_rgcn_qkvs_kernel(%arg0: i32, %arg1: memref<16x288xbf16, #tpu.memory_space<vmem>>, %arg2: memref<288x32xbf16, #tpu.memory_space<vmem>>, %arg3: memref<1x32xf32, #tpu.memory_space<vmem>>, %arg4: memref<32x128xbf16, #tpu.memory_space<vmem>>, %arg5: memref<1x128xf32, #tpu.memory_space<vmem>>, %arg6: memref<16x128xf32, #tpu.memory_space<vmem>>) attributes {dimension_semantics = [#tpu.dimension_semantics<parallel>], iteration_bounds = array<i64: 2>, scalar_prefetch = 0 : i64, scratch_operands = 0 : i64, tpu.core_type = #tpu.core_type<tc>, window_params = [{transform_indices = @transform_0, window_bounds = array<i64: 16, 288>}, {pipeline_mode = #tpu.pipeline_mode<synchronous>, transform_indices = @transform_1, window_bounds = array<i64: 288, 32>}, {pipeline_mode = #tpu.pipeline_mode<synchronous>, transform_indices = @transform_2, window_bounds = array<i64: 1, 32>}, {pipeline_mode = #tpu.pipeline_mode<synchronous>, transform_indices = @transform_3, window_bounds = array<i64: 32, 128>}, {pipeline_mode = #tpu.pipeline_mode<synchronous>, transform_indices = @transform_4, window_bounds = array<i64: 1, 128>}, {transform_indices = @transform_5, window_bounds = array<i64: 16, 128>}]} {
    %c0 = arith.constant 0 : index
    %c0_0 = arith.constant 0 : index
    %0 = vector.load %arg1[%c0, %c0_0] : memref<16x288xbf16, #tpu.memory_space<vmem>>, vector<16x288xbf16>
    %c0_1 = arith.constant 0 : index
    %c0_2 = arith.constant 0 : index
    %1 = vector.load %arg2[%c0_1, %c0_2] : memref<288x32xbf16, #tpu.memory_space<vmem>>, vector<288x32xbf16>
    %cst = arith.constant dense<0.000000e+00> : vector<16x32xf32>
    %2 = tpu.matmul %0, %1, %cst {dimension_numbers = #tpu.dot_dimension_numbers<[1], [0], [0], [1], [0, 0, 1, 1], [], []>} : vector<16x288xbf16>, vector<288x32xbf16>, vector<16x32xf32> -> vector<16x32xf32>
    %c0_3 = arith.constant 0 : index
    %c0_4 = arith.constant 0 : index
    %3 = vector.load %arg3[%c0_3, %c0_4] : memref<1x32xf32, #tpu.memory_space<vmem>>, vector<1x32xf32>
    %4 = vector.broadcast %3 : vector<1x32xf32> to vector<16x32xf32>
    %5 = arith.addf %2, %4 : vector<16x32xf32>
    %6 = arith.truncf %5 : vector<16x32xf32> to vector<16x32xbf16>
    %c0_5 = arith.constant 0 : index
    %c0_6 = arith.constant 0 : index
    %7 = vector.load %arg4[%c0_5, %c0_6] : memref<32x128xbf16, #tpu.memory_space<vmem>>, vector<32x128xbf16>
    %cst_7 = arith.constant dense<0.000000e+00> : vector<16x128xf32>
    %8 = tpu.matmul %6, %7, %cst_7 {dimension_numbers = #tpu.dot_dimension_numbers<[1], [0], [0], [1], [0, 0, 1, 1], [], []>} : vector<16x32xbf16>, vector<32x128xbf16>, vector<16x128xf32> -> vector<16x128xf32>
    %c0_8 = arith.constant 0 : index
    %c0_9 = arith.constant 0 : index
    %9 = vector.load %arg5[%c0_8, %c0_9] : memref<1x128xf32, #tpu.memory_space<vmem>>, vector<1x128xf32>
    %10 = vector.broadcast %9 : vector<1x128xf32> to vector<16x128xf32>
    %11 = arith.addf %8, %10 : vector<16x128xf32>
    %c0_10 = arith.constant 0 : index
    %c0_11 = arith.constant 0 : index
    %12 = vector.load %arg6[%c0_10, %c0_11] : memref<16x128xf32, #tpu.memory_space<vmem>>, vector<16x128xf32>
    tpu.vector_store %arg6[%c0_10, %c0_11], %11 {strides = array<i32>} : memref<16x128xf32, #tpu.memory_space<vmem>>, vector<16x128xf32>,
    return
  }
  func.func @transform_0(%arg0: i32) -> (i32, i32) {
    %c0_i32 = arith.constant 0 : i32
    %c0_i32_0 = arith.constant 0 : i32
    return %arg0, %c0_i32 : i32, i32
  }
  func.func @transform_1(%arg0: i32) -> (i32, i32) {
    %c0_i32 = arith.constant 0 : i32
    %c0_i32_0 = arith.constant 0 : i32
    %c0_i32_1 = arith.constant 0 : i32
    return %c0_i32, %c0_i32_0 : i32, i32
  }
  func.func @transform_2(%arg0: i32) -> (i32, i32) {
    %c0_i32 = arith.constant 0 : i32
    %c0_i32_0 = arith.constant 0 : i32
    %c0_i32_1 = arith.constant 0 : i32
    return %c0_i32, %c0_i32_0 : i32, i32
  }
  func.func @transform_3(%arg0: i32) -> (i32, i32) {
    %c0_i32 = arith.constant 0 : i32
    %c0_i32_0 = arith.constant 0 : i32
    %c0_i32_1 = arith.constant 0 : i32
    return %c0_i32, %c0_i32_0 : i32, i32
  }
  func.func @transform_4(%arg0: i32) -> (i32, i32) {
    %c0_i32 = arith.constant 0 : i32
    %c0_i32_0 = arith.constant 0 : i32
    %c0_i32_1 = arith.constant 0 : i32
    return %c0_i32, %c0_i32_0 : i32, i32
  }
  func.func @transform_5(%arg0: i32) -> (i32, i32) {
    %c0_i32 = arith.constant 0 : i32
    %c0_i32_0 = arith.constant 0 : i32
    return %arg0, %c0_i32 : i32, i32
  }
}

</mosaic_0001>

<bundles_post_ra>
// kernel: tpu_custom_call.1
= control target key start
LH: loop header
LB: loop body
LE: loop exit
PB: predicated region body
PF: predicated region fallthrough
CT: control target
= control target key end

     0   :  { %10 = vsyncpa [#allocation3], 0  ;;  %s1516_s0 = inlined_call_operand.hbm [shape: bf16[32,288], index: 0, kind: input, shape index: {}]   ;;  %s1517_s1 = inlined_call_operand.hbm [shape: bf16[288,32], index: 1, kind: input, shape index: {}]   ;;  %s1518_s2 = inlined_call_operand.hbm [shape: f32[1,32], index: 2, kind: input, shape index: {}]   ;;  %s1519_s3 = inlined_call_operand.hbm [shape: bf16[32,128], index: 3, kind: input, shape index: {}]   ;;  %s1520_s4 = inlined_call_operand.hbm [shape: f32[1,128], index: 4, kind: input, shape index: {}]   ;;  %s1521_s5 = inlined_call_operand.hbm [shape: f32[32,128], index: 5, kind: output, shape index: {}]  }
   0x1   :  { %12 = vsyncpa [#allocation3 + $0x1], 0 }
   0x2   :  { %13 = vsyncpa [#allocation6], 0 }
   0x3   :  { %14 = vsyncpa [#allocation9], 0 }
   0x4   :  { %15 = vsyncpa [#allocation4], 0 }
   0x5   :  { %17 = vsyncpa [#allocation4 + $0x1], 0  ;;  %s1229_s18 = smov 0   ;;  %s1231_s19 = smov 0  }
   0x6   :  { %s1233_s20 = smov 0   ;;  %s1235_s21 = smov 0  }
   0x7 LB: > { %s1250_s22 = sadd.s32 4294967295, %s1183_s21   ;;  %s752_s23 = sadd.s32 4294967294, %s1183_s21   ;;  %s1183_s21 = sphi %s1235_s21, %s1544_s21   ;;  %s1179_s20 = sphi %s1233_s20, %s1543_s20   ;;  %s1175_s19 = sphi %s1231_s19, %s1542_s19   ;;  %s1171_s18 = sphi %s1229_s18, %s1541_s18  }
   0x8   : > { %p43_p0 = scmp.ne.s32.totalorder %s1175_s19, %s1171_s18  ;;  %p1522_p1 = scmp.eq.s32.totalorder %s1250_s22, 0 }
   0x9   : > { %p157_p3 = scmp.eq.s32.totalorder %s752_s23, 1  ;;  %p753_p5 = scmp.ge.s32.totalorder %s1183_s21, 1 }
   0xa   : > { %p1259_p4 = por %p1522_p1, %p43_p0  ;;  %p164_p7 = scmp.lt.s32.totalorder %s1183_s21, 3 }
   0xb   : > { %p1264_p6 = por %p157_p3, %p43_p0  ;;  %s1185_s27 = smov [#allocation5]  }
   0xc   : > { %s1525_s24 = scalar_select %p1259_p4, 1, 0 }
   0xd   : > { %s1526_s25 = scalar_select %p1264_p6, 1, 0 }
   0xe   : > { %p1269_p8 = pnand %p753_p5, %p164_p7  ;;  %s176_s28 = sshll.u32 %s1185_s27, 4  ;;  %s1273_s28 = int_to_ptr.vmem [resolvable:$true] %s176_s28 }
   0xf   : > { %s1186_s30 = smov [#allocation8]   ;;  %s1187_s7 = smov [#allocation7]  }
  0x10   : > { %s1527_s26 = scalar_select %p1269_p8, 1, 0 }
  0x11   : > { %p868_p9 = pneg %p1269_p8  ;;  %s200_s6 = sshll.u32 %s1186_s30, 4  ;;  %s1284_s6 = int_to_ptr.vmem [resolvable:$true] %s200_s6 }
  0x12   : > { %s1286_s8 = sshll.u32 %s1187_s7, 4  ;;  %s967_s11 = scalar_lea.hbm %s1517_s1, 2304  ;;  %s191_s8 = int_to_ptr.vmem [resolvable:$true] %s1286_s8 }
  0x13   : > { %p1280_p11 = pnand %p868_p9, %p1522_p1  ;;  %p968_p12 = scmp.ne.s32.totalorder %s1517_s1, %s967_s11 }
  0x14   : > { %p974_p5 = scmp.lt.u32.totalorder %s967_s11, %s1517_s1 }
  0x15   : > { %p1296_p13 = pneg %p1280_p11 }
  0x17   : > { %p970_p0 = pnand %p1296_p13, %p968_p12 }
  0x19   : > { %p971_p3 = pneg %p970_p0 }
  0x1b   : > { %p976_p7 = pnand %p974_p5, %p971_p3 }
  0x1d   : > { %979 = shalt.err (!%p976_p7)
}
  0x1e   : > { %s980_s17 = scalar_lea.vmem %s1273_s28, 2304  ;;  %p988_p2 = scmp.lt.s32.totalorder %s1273_s28, %s1273_s28 }
  0x1f   : > { %p981_p9 = scmp.ne.s32.totalorder %s1273_s28, %s980_s17  ;;  %p989_p6 = scmp.lt.s32.totalorder %s980_s17, %s980_s17 }
  0x21   : > { %p983_p10 = pnand %p981_p9, %p1296_p13  ;;  %p990_p12 = por %p989_p6, %p988_p2 }
  0x23   : > { %p984_p1 = pneg %p983_p10 }
  0x25   : > { %p991_p0 = pnand %p990_p12, %p984_p1 }
  0x27   : > { %994 = shalt.err (!%p991_p0)
}
  0x28   : > { %s1188_s23 = smov 64   ;;  %s1189_s27 = smov 4  }
  0x29   : > { %871 = dma.hbm_to_vmem [thread:$0]  (!%p1280_p11), %s1517_s1, 2304, %s1273_s28, [#allocation6], %s1188_s23, %s1188_s23, %s1189_s27  }
  0x2a   : > { %s995_s11 = scalar_lea.hbm %s1519_s3, 256 }
  0x2b   : > { %p996_p2 = scmp.ne.s32.totalorder %s1519_s3, %s995_s11  ;;  %p1002_p10 = scmp.lt.u32.totalorder %s995_s11, %s1519_s3 }
  0x2d   : > { %p998_p1 = pnand %p996_p2, %p1296_p13 }
  0x2f   : > { %p999_p6 = pneg %p998_p1 }
  0x31   : > { %p1004_p3 = pnand %p1002_p10, %p999_p6 }
  0x33   : > { %1007 = shalt.err (!%p1004_p3)
}
  0x34   : > { %s1008_s28 = scalar_lea.vmem %s1284_s6, 256  ;;  %p1016_p12 = scmp.lt.s32.totalorder %s1284_s6, %s1284_s6 }
  0x35   : > { %p1009_p5 = scmp.ne.s32.totalorder %s1284_s6, %s1008_s28  ;;  %p1017_p0 = scmp.lt.s32.totalorder %s1008_s28, %s1008_s28 }
  0x37   : > { %p1011_p7 = pnand %p1009_p5, %p1296_p13  ;;  %p1018_p2 = por %p1017_p0, %p1016_p12 }
  0x39   : > { %p1012_p9 = pneg %p1011_p7 }
  0x3b   : > { %p1019_p1 = pnand %p1018_p2, %p1012_p9 }
  0x3d   : > { %1022 = shalt.err (!%p1019_p1)
}
  0x3e   : > { %877 = dma.hbm_to_vmem [thread:$0]  (!%p1280_p11), %s1519_s3, 256, %s1284_s6, [#allocation9], %s1188_s23, %s1188_s23, %s1189_s27  }
  0x3f   : > { %s1023_s10 = scalar_lea.hbm %s1518_s2, 16 }
  0x40   : > { %p1024_p6 = scmp.ne.s32.totalorder %s1518_s2, %s1023_s10  ;;  %p1030_p5 = scmp.lt.u32.totalorder %s1023_s10, %s1518_s2 }
  0x42   : > { %p1026_p10 = pnand %p1024_p6, %p1296_p13 }
  0x44   : > { %p1027_p3 = pneg %p1026_p10 }
  0x46   : > { %p1032_p7 = pnand %p1030_p5, %p1027_p3 }
  0x48   : > { %1035 = shalt.err (!%p1032_p7)
}
  0x49   : > { %s1036_s16 = scalar_lea.vmem %s191_s8, 16  ;;  %s1043_s6 = scalar_lea.vmem %s191_s8, 32 }
  0x4a   : > { %p1037_p9 = scmp.ne.s32.totalorder %s191_s8, %s1036_s16  ;;  %p1044_p2 = scmp.lt.s32.totalorder %s191_s8, %s191_s8 }
  0x4b   : > { %p1045_p1 = scmp.lt.s32.totalorder %s1043_s6, %s1036_s16 }
  0x4c   : > { %p1039_p12 = pnand %p1037_p9, %p1296_p13 }
  0x4d   : > { %p1046_p4 = por %p1045_p1, %p1044_p2 }
  0x4e   : > { %p1040_p0 = pneg %p1039_p12 }
  0x50   : > { %p1047_p8 = pnand %p1046_p4, %p1040_p0 }
  0x52   : > { %1050 = shalt.err (!%p1047_p8)
}
  0x53   : > { %874 = dma.hbm_to_vmem [thread:$0]  (!%p1280_p11), %s1518_s2, 16, %s191_s8, [#allocation6]  }
  0x54   : > { %s1190_s28 = smov [#allocation10]   ;;  %s1051_s9 = scalar_lea.hbm %s1520_s4, 16 }
  0x55   : > { %s214_s17 = sshll.u32 %s1190_s28, 4  ;;  %p1052_p6 = scmp.ne.s32.totalorder %s1520_s4, %s1051_s9  ;;  %s215_s17 = int_to_ptr.vmem [resolvable:$true] %s214_s17 }
  0x56   : > { %p1058_p10 = scmp.lt.u32.totalorder %s1051_s9, %s1520_s4 }
  0x57   : > { %p1054_p4 = pnand %p1052_p6, %p1296_p13 }
  0x59   : > { %p1055_p8 = pneg %p1054_p4 }
  0x5b   : > { %p1060_p3 = pnand %p1058_p10, %p1055_p8 }
  0x5d   : > { %1063 = shalt.err (!%p1060_p3)
}
  0x5e   : > { %s1064_s8 = scalar_lea.vmem %s215_s17, 16  ;;  %s1071_s15 = scalar_lea.vmem %s215_s17, 32 }
  0x5f   : > { %p1065_p5 = scmp.ne.s32.totalorder %s215_s17, %s1064_s8  ;;  %p1072_p12 = scmp.lt.s32.totalorder %s215_s17, %s215_s17 }
  0x60   : > { %p1073_p0 = scmp.lt.s32.totalorder %s1071_s15, %s1064_s8 }
  0x61   : > { %p1067_p7 = pnand %p1065_p5, %p1296_p13 }
  0x62   : > { %p1074_p2 = por %p1073_p0, %p1072_p12 }
  0x63   : > { %p1068_p9 = pneg %p1067_p7 }
  0x65   : > { %p1075_p1 = pnand %p1074_p2, %p1068_p9 }
  0x67   : > { %1078 = shalt.err (!%p1075_p1)
}
  0x68   : > { %880 = dma.hbm_to_vmem [thread:$0]  (!%p1280_p11), %s1520_s4, 16, %s215_s17, [#allocation9]  }
  0x69   : > { %s1378_s14 = sadd.s32 1, %s1183_s21   ;;  %s30_s23 = sadd.s32 1, %s1179_s20 }
  0x6a   : > { %s27_s29 = ssub.s32 %s1183_s21, %s1378_s14  ;;  %p37_p13 = scmp.ne.s32.totalorder %s1179_s20, %s1175_s19 }
  0x6b   : > { %p28_p6 = scmp.eq.s32.totalorder %s27_s29, 0  ;;  %p38_p4 = scmp.eq.s32.totalorder %s1183_s21, 0 }
  0x6c   : > { %p1530_p8 = scmp.eq.s32.totalorder %s1250_s22, 1  ;;  %p893_p3 = scmp.lt.s32.totalorder %s1183_s21, 2 }
  0x6d   : > { %s1394_s28 = scalar_select %p28_p6, %s1179_s20, %s30_s23  }
  0x6e   : > { %p1388_p10 = por %p1530_p8, %p37_p13  ;;  %p39_p5 = por %p38_p4, %p37_p13 }
  0x6f   : > { %s225_s30 = sand.u32 1, %s1179_s20   ;;  %s846_s17 = smul.u32 384, %s1183_s21 }
  0x70   : > { %s845_s7 = smul.u32 24, %s225_s30  ;;  %p1398_p11 = pnand %p893_p3, %p39_p5 }
  0x71   : > { %s1405_s12 = scalar_lea.hbm %s1516_s0, %s846_s17  ;;  %s1409_s15 = scalar_lea.sflag [#allocation3], %s225_s30 }
  0x72   : > { %s229_s13 = scalar_lea.vmem [#allocation2], %s845_s7  ;;  %s1079_s16 = scalar_lea.hbm %s1405_s12, 384 }
  0x73   : > { %s237_s8 = sshll.u32 %s229_s13, 4  ;;  %p1080_p7 = scmp.ne.s32.totalorder %s1405_s12, %s1079_s16  ;;  %s1407_s8 = int_to_ptr.vmem [resolvable:$true] %s237_s8 }
  0x74   : > { %p1081_p9 = pneg %p1398_p11  ;;  %s1084_s29 = scalar_lea.hbm %s1516_s0, 768 }
  0x75   : > { %p1085_p2 = scmp.lt.u32.totalorder %s1405_s12, %s1516_s0  ;;  %p1086_p1 = scmp.lt.u32.totalorder %s1084_s29, %s1079_s16 }
  0x76   : > { %p1082_p12 = pnand %p1081_p9, %p1080_p7  ;;  %p1088_p6 = scmp.lt.u32.totalorder %s1079_s16, %s1405_s12 }
  0x77   : > { %p1087_p13 = por %p1086_p1, %p1085_p2 }
  0x78   : > { %p1083_p0 = pneg %p1082_p12 }
  0x79   : > { %p1089_p4 = por %p1088_p6, %p1087_p13 }
  0x7b   : > { %p1090_p8 = pnand %p1089_p4, %p1083_p0 }
  0x7d   : > { %1093 = shalt.err (!%p1090_p8)
}
  0x7e   : > { %s1094_s30 = scalar_lea.vmem %s1407_s8, 384  ;;  %s1191_s7 = smov [#allocation2]  }
  0x7f   : > { %p1095_p3 = scmp.ne.s32.totalorder %s1407_s8, %s1094_s30  ;;  %s1099_s11 = sshll.u32 %s1191_s7, 4  ;;  %s1100_s11 = int_to_ptr.vmem [resolvable:$false] %s1099_s11 }
  0x80   : > { %s1101_s13 = scalar_lea.vmem %s1100_s11, 768  ;;  %p1102_p12 = scmp.lt.s32.totalorder %s1407_s8, %s1100_s11 }
  0x81   : > { %p1097_p5 = pnand %p1095_p3, %p1081_p9  ;;  %p1103_p2 = scmp.lt.s32.totalorder %s1101_s13, %s1094_s30 }
  0x83   : > { %p1098_p7 = pneg %p1097_p5  ;;  %p1104_p1 = por %p1103_p2, %p1102_p12 }
  0x85   : > { %p1105_p13 = pnand %p1104_p1, %p1098_p7 }
  0x87   : > { %1108 = shalt.err (!%p1105_p13)
}
  0x88   : > { %s1192_s16 = smov 192   ;;  %s1193_s6 = smov 12  }
  0x89   : > { %884 = dma.hbm_to_vmem [thread:$0]  (!%p1398_p11), %s1405_s12, 384, %s1407_s8, %s1409_s15, %s1192_s16, %s1192_s16, %s1193_s6  }
  0x8a   : > { %p1533_p9 = scmp.ne.s32.totalorder %s1527_s26, 0 }
  0x8b   : > { %s1440_s23 = sand.u32 (!%p1533_p9), 1, %s1175_s19   ;;  %p1534_p0 = scmp.ne.s32.totalorder (!%p1533_p9), %s1525_s24, 0 }
  0x8c   : > { %249 = sbr.rel (%p1533_p9) target bundleno = 643 (0x283), region = 40  ;;  %s252_s17 = scalar_lea.sflag (!%p1533_p9), [#allocation3], %s1440_s23 }
  0x8d   : > { %s847_s29 = smul.u32 (!%p1533_p9), 24, %s1440_s23 }
  0x8f   : > { %s1444_s10 = scalar_lea.vmem (!%p1533_p9), [#allocation2], %s847_s29 }
  0x93   : > { %1154 = dma.done.wait (%p1534_p0), %s252_s17, 384  }
  0x94   : > { %1156 = vsyncadd (%p1534_p0), %s252_s17, 4294966912  ;;  %p1535_p11 = scmp.eq.s32.totalorder %s1250_s22, 0 }
  0x96   : > { %1158 = dma.done.wait (%p1535_p11), [#allocation6], 2320   ;;  %p1536_p6 = pmov %p1535_p11 }
  0x98   : > { %1160 = vsyncadd (%p1536_p6), [#allocation6], 4294964976  ;;  %p1537_p4 = pmov %p1536_p6 }
  0x9a   : > { %1162 = dma.done.wait (%p1537_p4), [#allocation9], 272   ;;  %p1538_p8 = pmov %p1537_p4 }
  0x9b   : > { %v1194_v0 = vmov 0.0   ;;  %vm1195_vm0 = vmmov 0   ;;  %v943_v1 = vld [vmem:[#allocation5 + $0x40] sm:$0xff]   ;;  %v945_v3 = vld [vmem:[#allocation5 + $0x48] sm:$0xff]   ;;  %v947_v5 = vld [vmem:[#allocation5 + $0x50] sm:$0xff]   ;;  %vm471_vm1 = vcmask 261120  }
  0x9c   : > { %1164 = vsyncadd (%p1538_p8), [#allocation9], 4294967024  ;;  %829 = vmatprep.subr.bf16.mxu1 %v1194_v0  ;;  %833 = vmatprep.mubr.msk.bf16.mxu1 %vm1195_vm0, %v1194_v0  ;;  %v944_v2 = vld [vmem:[#allocation5] sm:$0xff]   ;;  %v946_v4 = vld [vmem:[#allocation5 + $0x8] sm:$0xff]   ;;  %s767_s24 = sshll.u32 %s1440_s23, 4  ;;  %s800_s12 = sshll.u32 %s1250_s22, 8 }
  0x9d   : > { %801 = vmatprep.subr.bf16.mxu0 %v943_v1  ;;  %v948_v6 = vld [vmem:[#allocation5 + $0x10] sm:$0xff]   ;;  %v949_v7 = vld [vmem:[#allocation5 + $0x58] sm:$0xff]   ;;  %v951_v9 = vld [vmem:[#allocation5 + $0x60] sm:$0xff]   ;;  %s297_s26 = scalar_lea.vmem [#allocation11], %s767_s24  ;;  %s1472_s30 = scalar_lea.hbm %s1521_s5, %s800_s12 }
  0x9e   : > { %802 = vmatpush3.bf16.msra.mxu0 %v944_v2  ;;  %v950_v8 = vld [vmem:[#allocation5 + $0x18] sm:$0xff]   ;;  %v957_v10 = vld [vmem:[#allocation5 + $0x80] sm:$0xff]   ;;  %v953_v12 = vld [vmem:[#allocation5 + $0x68] sm:$0xff]   ;;  %s641_s9 = sshll.u32 %s297_s26, 4  ;;  %s628_s7 = scalar_lea.sflag [#allocation4], %s1440_s23  ;;  %s1467_s9 = int_to_ptr.vmem [resolvable:$true] %s641_s9 }
  0x9f   : > { %803 = vmatprep.subr.bf16.mxu0 %v945_v3  ;;  %v952_v11 = vld [vmem:[#allocation5 + $0x20] sm:$0xff]   ;;  %830 = vmatpush3.bf16.msra.mxu1 %v957_v10  ;;  %v954_v13 = vld [vmem:[#allocation5 + $0x28] sm:$0xff]   ;;  %v955_v14 = vld [vmem:[#allocation5 + $0x70] sm:$0xff]   ;;  %s1109_s22 = scalar_lea.vmem %s1467_s9, 256  ;;  %s1196_s11 = smov [#allocation11]  }
  0xa0   : > { %831 = vmatprep.subr.bf16.mxu1 %v1194_v0  ;;  %v962_v15 = vld [vmem:[%s1444_s10 + $0x4] ss:$12 sps:$4 sm:$0xff]   ;;  %v964_v17 = vld [vmem:[%s1444_s10 + $0x8] ss:$12 sps:$4 sm:$0xff]   ;;  %v960_v21 = vld [vmem:[%s1444_s10] ss:$12 sps:$4 sm:$0xff]   ;;  %p1110_p3 = scmp.ne.s32.totalorder %s1467_s9, %s1109_s22 }
  0xa1   : > { %v963_v16 = vld [vmem:[#allocation5 + $0x88] sm:$0xff]   ;;  %507 = vmatprep.mubr.bf16.mxu0 %v962_v15  ;;  %v956_v18 = vld [vmem:[#allocation5 + $0x30] sm:$0xff]   ;;  %v958_v19 = vld [vmem:[#allocation5 + $0x78] sm:$0xff]   ;;  %s1113_s13 = sshll.u32 %s1196_s11, 4  ;;  %s1114_s13 = int_to_ptr.vmem [resolvable:$false] %s1113_s13 }
  0xa2   : > { %804 = vmatpush3.bf16.msra.mxu0 %v946_v4  ;;  %v959_v20 = vld [vmem:[#allocation5 + $0x38] sm:$0xff]   ;;  %v768_v30 = vld [vmem:[#allocation7] ss:$0 sm:$0xff]  ;;  %v791_v40 = vld [vmem:[#allocation10] ss:$0 sm:$0xff]  ;;  %p1111_p5 = pnand %p1110_p3, %p1388_p10  ;;  %s1115_s16 = scalar_lea.vmem %s1114_s13, 512 }
  0xa3   : > { %805 = vmatprep.subr.bf16.mxu0 %v947_v5  ;;  %832 = vmatpush3.bf16.msra.mxu1 %v963_v16  ;;  %v965_v22 = vld [vmem:[#allocation8] sm:$0xff]   ;;  %v966_v23 = vld [vmem:[#allocation8 + $0x8] sm:$0xff]   ;;  %p1116_p12 = scmp.lt.s32.totalorder %s1467_s9, %s1114_s13  ;;  %p1117_p2 = scmp.lt.s32.totalorder %s1115_s16, %s1109_s22 }
  0xa4   : > { %837 = vmatprep.subr.bf16.mxu1 %v1194_v0  ;;  %p1112_p7 = pneg %p1111_p5 }
  0xa5   : > { %p1118_p1 = por %p1117_p2, %p1116_p12 }
  0xa6   : > { %806 = vmatpush3.bf16.msra.mxu0 %v948_v6  ;;  %834 = vmatmul.mubr.msk.bf16.vlgmr.msra.gmra.mrb[0].mxu1 %vm471_vm1, %v964_v17 }
  0xa7   : > { %807 = vmatprep.subr.bf16.mxu0 %v949_v7  ;;  %841 = vmatprep.mubr.msk.bf16.mxu1 %vm1195_vm0, %v1194_v0  ;;  %p1119_p13 = pnand %p1118_p1, %p1112_p7 }
  0xa8   : > { %838 = vmatpush3.bf16.msra.mxu1 %v965_v22 }
  0xa9   : > { %839 = vmatprep.subr.bf16.mxu1 %v1194_v0 }
  0xaa   : > { %808 = vmatpush3.bf16.msra.mxu0 %v950_v8 }
  0xab   : > { %809 = vmatprep.subr.bf16.mxu0 %v951_v9 }
  0xac   : > { %840 = vmatpush3.bf16.msra.mxu1 %v966_v23 }
  0xae   : > { %810 = vmatpush3.bf16.msra.mxu0 %v952_v11 }
  0xaf   : > { %811 = vmatprep.subr.bf16.mxu0 %v953_v12 }
  0xb2   : > { %812 = vmatpush3.bf16.msra.mxu0 %v954_v13 }
  0xb3   : > { %813 = vmatprep.subr.bf16.mxu0 %v955_v14 }
  0xb6   : > { %814 = vmatpush3.bf16.msra.mxu0 %v956_v18 }
  0xb7   : > { %815 = vmatprep.subr.bf16.mxu0 %v958_v19 }
  0xba   : > { %816 = vmatpush3.bf16.msra.mxu0 %v959_v20 }
  0xbd   : > { %508 = vmatmul.mubr.bf16.vlgmr.msra.gmra.mrb[0].mxu0 %v960_v21 }
 0x179   : > { %v550_v24 = vpop.f32.mrb[0].mxu1 }
 0x17a   : > { %v835_v25 = vpop.f32.mrb[1].mxu1 }
 0x17b   : > { %v553_v26 = vpop.f32.mrb[2].mxu1 }
 0x17c   : > { %v836_v27 = vpop.f32.mrb[3].mxu1 }
 0x190   : > { %v817_v28 = vpop.f32.mrb[0].mxu0 }
 0x191   : > { %v818_v29 = vpop.f32.mrb[1].mxu0 }
 0x192   : > { %v819_v31 = vadd.f32 %v818_v29, %v817_v28  ;;  %v820_v32 = vpop.f32.mrb[2].mxu0 }
 0x193   : > { %v821_v33 = vpop.f32.mrb[3].mxu0 }
 0x194   : > { %v510_v34 = vadd.f32 %v819_v31, %v768_v30  ;;  %v822_v35 = vadd.f32 %v821_v33, %v820_v32 }
 0x196   : > { %v551_v36 = vadd.f32 %v550_v24, %v510_v34  ;;  %v513_v37 = vadd.f32 %v822_v35, %v768_v30 }
 0x198   : > { %v554_v38 = vadd.f32 %v553_v26, %v513_v37 }
 0x19a   : > { %v557_v39 = vpack.c.bf16 %v554_v38, %v551_v36 }
 0x19c   : > { %842 = vmatmul.mubr.msk.bf16.vlgmr.msra.gmra.mrb[4].mxu1 %vm471_vm1, %v557_v39 }
 0x26f   : > { %v618_v41 = vpop.f32.mrb[4].mxu1 }
 0x270   : > { %v619_v42 = vadd.f32 %v791_v40, %v618_v41  ;;  %v843_v43 = vpop.f32.mrb[5].mxu1 }
 0x271   : > { %v621_v44 = vpop.f32.mrb[6].mxu1 }
 0x272   : > { %625 = vst [vmem:[%s297_s26] sm:$0xff] %v619_v42  ;;  %v622_v45 = vadd.f32 %v791_v40, %v621_v44  ;;  %v844_v46 = vpop.f32.mrb[7].mxu1 }
 0x274   : > { %626 = vst [vmem:[%s297_s26 + $0x8] sm:$0xff] %v622_v45 }
 0x275   : > { %1122 = shalt.err (!%p1119_p13)
}
 0x276   : > { %s1123_s6 = scalar_lea.hbm %s1472_s30, 256  ;;  %s1127_s10 = scalar_lea.hbm %s1521_s5, 512 }
 0x277   : > { %p1124_p9 = scmp.ne.s32.totalorder %s1472_s30, %s1123_s6  ;;  %p1128_p6 = scmp.lt.u32.totalorder %s1472_s30, %s1521_s5 }
 0x278   : > { %p1129_p4 = scmp.lt.u32.totalorder %s1127_s10, %s1123_s6  ;;  %p1131_p3 = scmp.lt.u32.totalorder %s1123_s6, %s1472_s30 }
 0x279   : > { %p1125_p0 = pnand %p1124_p9, %p1388_p10 }
 0x27a   : > { %p1130_p8 = por %p1129_p4, %p1128_p6 }
 0x27b   : > { %p1126_p11 = pneg %p1125_p0 }
 0x27c   : > { %p1132_p5 = por %p1131_p3, %p1130_p8 }
 0x27e   : > { %p1133_p7 = pnand %p1132_p5, %p1126_p11 }
 0x280   : > { %1136 = shalt.err (!%p1133_p7)
}
 0x281   : > { %s1197_s12 = smov 128   ;;  %s1198_s8 = smov 8  }
 0x282   : > { %866 = dma.vmem_to_hbm [thread:$0]  (%p1388_p10), %s1467_s9, 256, %s1472_s30, %s628_s7, %s1197_s12, %s1197_s12, %s1198_s8  }
 0x283 PF: > { %s656_s15 = sand.u32 1, %s1171_s18   ;;  %p1539_p12 = scmp.ne.s32.totalorder %s1526_s25, 0 }
 0x284   : > { %p1540_p2 = scmp.ge.s32.totalorder %s1183_s21, 2  ;;  %s657_s22 = scalar_lea.sflag [#allocation4], %s656_s15 }
 0x286   : > { %p886_p1 = pnand %p1540_p2, %p1539_p12 }
 0x288   : > { %1166 = dma.done.wait (!%p886_p1), %s657_s22, 256  }
 0x289   : > { %1168 = vsyncadd (!%p886_p1), %s657_s22, 4294967040  ;;  %p20_p13 = scmp.ge.s32.totalorder %s1378_s14, 4   ;;  %s1541_s18 = smov %s1175_s19 }
 0x28a   : > { %s1542_s19 = smov %s1179_s20  ;;  %s1543_s20 = smov %s1394_s28 }
 0x28b   : > { %s1544_s21 = smov %s1378_s14  ;;  %22 = sbr.rel (!%p20_p13) target bundleno = 7 (0x7), region = 101 }
 0x292   :  { %662 = vsyncpa [#allocation3], 1 }
 0x293   :  { %664 = vsyncpa [#allocation3 + $0x1], 1 }
 0x294   :  { %665 = vsyncpa [#allocation6], 1 }
 0x295   :  { %666 = vsyncpa [#allocation9], 1 }
 0x296   :  { %667 = vsyncpa [#allocation4], 1 }
 0x297   :  { %669 = vsyncpa [#allocation4 + $0x1], 1 }

</bundles_post_ra>
